<compile_context>
chip_gen: v7x
topology: tpu7x:2x2x1
jax: 0.10.0
libtpu: 0.0.40
codegen_flags: <defaults>
</compile_context>

<pallas_src>
import functools

import jax
import jax.numpy as jnp
from jax.experimental import pallas as pl
from jax.experimental.pallas import tpu as pltpu


def _round_up(x: int, m: int) -> int:
    return (x + m - 1) // m * m


def _moving_avg_kernel(x_ref, halo_ref, o_ref, comb_ref, *, window, inv_window):
    """Computes one (TM, TL) output tile of the uniform moving average.

    x_ref:    (TM, TL)         main input tile (rows = flattened batch*channel)
    halo_ref: (TM, HALO)       the next HALO input columns of the same rows
    o_ref:    (TM, TL)         output tile
    comb_ref: (TM, TL + HALO)  VMEM scratch holding [main | halo]
    """
    tl = x_ref.shape[-1]

    # Assemble [main | halo] once with lane-aligned stores; each HBM block is loaded
    # exactly once and every tap below is a plain static slice of this scratch.
    comb_ref[:, :tl] = x_ref[...].astype(comb_ref.dtype)
    comb_ref[:, tl:] = halo_ref[...].astype(comb_ref.dtype)

    def tap(t):
        # Static lane-offset slice; Mosaic lowers this to streamed loads + lane shift,
        # no full-width rolled temporary is materialized.
        return comb_ref[:, t:t + tl].astype(jnp.float32)

    # Pairwise-leaf summation: halves the serial dependency chain while keeping at
    # most two (TM, TL) f32 temporaries live (limits vreg pressure / spills).
    acc = None
    for t in range(0, window - 1, 2):
        pair = tap(t) + tap(t + 1)
        acc = pair if acc is None else acc + pair
    if window % 2 == 1:
        last = tap(window - 1)
        acc = last if acc is None else acc + last

    # Uniform 1/W weight folded into a single final scale.
    o_ref[...] = (acc * inv_window).astype(o_ref.dtype)


def moving_avg(x, window_size, *, max_lane_tile=2048, max_row_tile=512):
    """x: (B, C, L); returns (B, C, L - W + 1). Uniform depthwise moving average."""
    b, c, l = x.shape
    w = int(window_size)
    l_out = l - w + 1
    if l_out <= 0:
        raise ValueError("window_size must be <= sequence length")

    n = b * c
    x_flat = x.reshape(n, l)  # merge of leading dims: free, no HBM copy

    # Halo must cover the W-1 extra columns the last output of a tile needs; keep it a
    # 128 multiple so the halo block index is expressible with Blocked indexing.
    halo_blk = max(128, _round_up(w - 1, 128))
    tl = min(_round_up(l_out, halo_blk), _round_up(max_lane_tile, halo_blk))

    tm = min(max_row_tile, _round_up(n, 8))
    # Prefer >=2 row tiles so the "parallel" row axis can be sharded across TensorCores.
    if n > 8 and pl.cdiv(n, tm) < 2:
        tm = max(8, _round_up(pl.cdiv(n, 2), 8))

    row_tiles = pl.cdiv(n, tm)
    l_tiles = pl.cdiv(l_out, tl)
    tl_in_halo_blocks = tl // halo_blk
    # Last halo block index whose start is still < L (DMA start stays in-bounds).
    # If the clamp engages for tile j, then (j+1)*tl >= L, and every *valid* output
    # column p < L_out = L-W+1 of that tile needs inputs only up to p+W-1 <= L-1
    # < (j+1)*tl, i.e. only the main block — so clamped halo content is never used.
    last_halo_block = max(0, (l - 1) // halo_blk)

    def halo_index_map(i, j):
        return (i, jnp.minimum((j + 1) * tl_in_halo_blocks, last_halo_block))

    # bf16 inputs: keep the scratch in bf16 (v6e/v7x VALU is bf16-native), accumulate
    # in f32 inside the kernel.  Everything else uses f32 scratch.
    if x.dtype == jnp.bfloat16 or x.dtype == jnp.float32:
        comb_dtype = x.dtype
    else:
        comb_dtype = jnp.float32

    itemsize = jnp.dtype(x.dtype).itemsize
    vmem_bytes = (
        2 * tm * tl * itemsize            # main input blocks, double-buffered
        + 2 * tm * halo_blk * itemsize    # halo input blocks, double-buffered
        + 2 * tm * tl * itemsize          # output blocks, double-buffered
        + tm * (tl + halo_blk) * jnp.dtype(comb_dtype).itemsize  # comb scratch
    )
    # Generous headroom for compiler temporaries, capped at 48 MiB so the same config
    # also fits v7x's 64 MiB per-TensorCore VMEM.
    vmem_limit = int(min(48 * 1024 * 1024, vmem_bytes * 3 // 2 + (8 << 20)))

    kernel = functools.partial(_moving_avg_kernel, window=w, inv_window=1.0 / w)

    out_flat = pl.pallas_call(
        kernel,
        out_shape=jax.ShapeDtypeStruct((n, l_out), x.dtype),
        grid_spec=pltpu.PrefetchScalarGridSpec(
            num_scalar_prefetch=0,
            grid=(row_tiles, l_tiles),
            in_specs=[
                # Main tile: rows block i, time block j.
                pl.BlockSpec((tm, tl), lambda i, j: (i, j)),
                # Halo tile: the halo_blk columns starting at element (j+1)*tl,
                # expressed as a (clamped) block index of a halo_blk-wide blocking
                # of the same array.
                pl.BlockSpec((tm, halo_blk), halo_index_map),
            ],
            out_specs=pl.BlockSpec((tm, tl), lambda i, j: (i, j)),
            scratch_shapes=[pltpu.VMEM((tm, tl + halo_blk), comb_dtype)],
        ),
        compiler_params=pltpu.CompilerParams(
            dimension_semantics=("parallel", "parallel"),
            vmem_limit_bytes=vmem_limit,
        ),
        cost_estimate=pl.CostEstimate(
            flops=n * l_out * (w + 1),
            transcendentals=0,
            bytes_accessed=n * l * itemsize + n * l_out * itemsize,
        ),
    )(x_flat, x_flat)

    return out_flat.reshape(b, c, l_out)


class MovingAvg:
    """JAX/Pallas port of the PyTorch MovingAvg module (depthwise conv1d, groups=C)."""

    def __init__(self, input_shape, window_size):
        assert len(input_shape) == 2, "Expecting shape in format (n_channels, seq_len)!"
        self.num_dim, self.length_x = input_shape
        self.window_size = window_size
        new_length = self.length_x - self.window_size + 1
        self.output_shape = (self.num_dim, new_length)
        # Kept only for API parity with the PyTorch module: the weights there are the
        # fixed uniform 1/window_size kernel (not a registered Parameter), so the
        # Pallas kernel folds them into a single final scale.
        self.kernel_weights = (
            jnp.ones((self.num_dim, 1, self.window_size), dtype=jnp.float32) / self.window_size
        )

    def __call__(self, x):
        return moving_avg(x, self.window_size)


if __name__ == "__main__":
    B, C, L, W = 2, 4, 16, 5  # batch, channels, seq_len, window
    key = jax.random.PRNGKey(0)
    x = jax.random.normal(key, (B, C, L), dtype=jnp.float32)

    mod = MovingAvg((C, L), W)
    out = jax.block_until_ready(mod(x))

    # Pure-JAX reference: depthwise uniform moving average.
    l_out = L - W + 1
    ref = jnp.stack([x[:, :, i:i + l_out] for i in range(W)], axis=0).mean(axis=0)

    assert out.shape == (B, C, l_out), out.shape
    assert jnp.allclose(out, ref, atol=1e-5, rtol=1e-5), "mismatch vs reference"
    print("KERNEL_OK")
</pallas_src>

<mosaic_0001>
module attributes {stable_mosaic.version = 11 : i64} {
  func.func @_moving_avg_kernel(%arg0: i32, %arg1: i32, %arg2: memref<8x128xf32, #tpu.memory_space<vmem>>, %arg3: memref<8x128xf32, #tpu.memory_space<vmem>>, %arg4: memref<8x128xf32, #tpu.memory_space<vmem>>, %arg5: memref<8x256xf32, #tpu.memory_space<vmem>>) attributes {dimension_semantics = [#tpu.dimension_semantics<parallel>, #tpu.dimension_semantics<parallel>], iteration_bounds = array<i64: 1, 1>, scalar_prefetch = 0 : i64, scratch_operands = 1 : i64, tpu.core_type = #tpu.core_type<tc>, window_params = [{transform_indices = @transform_0, window_bounds = array<i64: 8, 128>}, {transform_indices = @transform_1, window_bounds = array<i64: 8, 128>}, {transform_indices = @transform_2, window_bounds = array<i64: 8, 128>}]} {
    %c0 = arith.constant 0 : index
    %c0_0 = arith.constant 0 : index
    %0 = vector.load %arg2[%c0, %c0_0] : memref<8x128xf32, #tpu.memory_space<vmem>>, vector<8x128xf32>
    %c0_1 = arith.constant 0 : index
    %c0_2 = arith.constant 0 : index
    %1 = vector.load %arg5[%c0_1, %c0_2] : memref<8x256xf32, #tpu.memory_space<vmem>>, vector<8x128xf32>
    tpu.vector_store %arg5[%c0_1, %c0_2], %0 {strides = array<i32>} : memref<8x256xf32, #tpu.memory_space<vmem>>, vector<8x128xf32>,
    %c0_3 = arith.constant 0 : index
    %c0_4 = arith.constant 0 : index
    %2 = vector.load %arg3[%c0_3, %c0_4] : memref<8x128xf32, #tpu.memory_space<vmem>>, vector<8x128xf32>
    %c0_5 = arith.constant 0 : index
    %c128 = arith.constant 128 : index
    %3 = vector.load %arg5[%c0_5, %c128] : memref<8x256xf32, #tpu.memory_space<vmem>>, vector<8x128xf32>
    tpu.vector_store %arg5[%c0_5, %c128], %2 {strides = array<i32>} : memref<8x256xf32, #tpu.memory_space<vmem>>, vector<8x128xf32>,
    %c0_6 = arith.constant 0 : index
    %c0_7 = arith.constant 0 : index
    %4 = vector.load %arg5[%c0_6, %c0_7] : memref<8x256xf32, #tpu.memory_space<vmem>>, vector<8x128xf32>
    %c0_8 = arith.constant 0 : index
    %c1 = arith.constant 1 : index
    %5 = vector.load %arg5[%c0_8, %c1] : memref<8x256xf32, #tpu.memory_space<vmem>>, vector<8x128xf32>
    %6 = arith.addf %4, %5 : vector<8x128xf32>
    %c0_9 = arith.constant 0 : index
    %c2 = arith.constant 2 : index
    %7 = vector.load %arg5[%c0_9, %c2] : memref<8x256xf32, #tpu.memory_space<vmem>>, vector<8x128xf32>
    %c0_10 = arith.constant 0 : index
    %c3 = arith.constant 3 : index
    %8 = vector.load %arg5[%c0_10, %c3] : memref<8x256xf32, #tpu.memory_space<vmem>>, vector<8x128xf32>
    %9 = arith.addf %7, %8 : vector<8x128xf32>
    %10 = arith.addf %6, %9 : vector<8x128xf32>
    %c0_11 = arith.constant 0 : index
    %c4 = arith.constant 4 : index
    %11 = vector.load %arg5[%c0_11, %c4] : memref<8x256xf32, #tpu.memory_space<vmem>>, vector<8x128xf32>
    %12 = arith.addf %10, %11 : vector<8x128xf32>
    %cst = arith.constant 2.000000e-01 : f32
    %13 = vector.broadcast %cst : f32 to vector<8x128xf32>
    %14 = arith.mulf %12, %13 : vector<8x128xf32>
    %c0_12 = arith.constant 0 : index
    %c0_13 = arith.constant 0 : index
    %15 = vector.load %arg4[%c0_12, %c0_13] : memref<8x128xf32, #tpu.memory_space<vmem>>, vector<8x128xf32>
    tpu.vector_store %arg4[%c0_12, %c0_13], %14 {strides = array<i32>} : memref<8x128xf32, #tpu.memory_space<vmem>>, vector<8x128xf32>,
    return
  }
  func.func @transform_0(%arg0: i32, %arg1: i32) -> (i32, i32) {
    %c0_i32 = arith.constant 0 : i32
    return %arg0, %arg1 : i32, i32
  }
  func.func @transform_1(%arg0: i32, %arg1: i32) -> (i32, i32) {
    %c1_i32 = arith.constant 1 : i32
    %0 = arith.addi %arg1, %c1_i32 : i32
    %c1_i32_0 = arith.constant 1 : i32
    %1 = arith.muli %0, %c1_i32_0 : i32
    %c0_i32 = arith.constant 0 : i32
    %2 = arith.minsi %1, %c0_i32 : i32
    %c0_i32_1 = arith.constant 0 : i32
    return %arg0, %2 : i32, i32
  }
  func.func @transform_2(%arg0: i32, %arg1: i32) -> (i32, i32) {
    %c0_i32 = arith.constant 0 : i32
    return %arg0, %arg1 : i32, i32
  }
}

</mosaic_0001>

<bundles_post_ra>
// kernel: tpu_custom_call.1
= control target key start
LH: loop header
LB: loop body
LE: loop exit
PB: predicated region body
PF: predicated region fallthrough
CT: control target
= control target key end

     0   :  { %7 = vsyncpa [#allocation4], 0  ;;  %s237_s0 = inlined_call_operand.hbm [shape: f32[8,16], index: 0, kind: input, shape index: {}]   ;;  %s238_s1 = inlined_call_operand.hbm [shape: f32[8,16], index: 1, kind: input, shape index: {}]   ;;  %s239_s2 = inlined_call_operand.hbm [shape: f32[8,12], index: 2, kind: output, shape index: {}]  }
   0x1   :  { %8 = vsyncpa [#allocation7], 0 }
   0x2   :  { %9 = vsyncpa [#allocation5], 0  ;;  %s180_s9 = smov [#allocation3]   ;;  %s181_s11 = smov [#allocation6]  }
   0x3   :  { %s16_s10 = sshll.u32 %s180_s9, 4  ;;  %s31_s12 = sshll.u32 %s181_s11, 4  ;;  %s17_s10 = int_to_ptr.vmem [resolvable:$true] %s16_s10  ;;  %s32_s12 = int_to_ptr.vmem [resolvable:$true] %s31_s12 }
   0x4   :  { %s108_s15 = scalar_lea.hbm %s237_s0, 128 }
   0x5   :  { %p109_p0 = scmp.ne.s32.totalorder %s237_s0, %s108_s15  ;;  %p112_p1 = scmp.lt.u32.totalorder %s108_s15, %s237_s0 }
   0x7   :  { %p114_p2 = pnand %p112_p1, %p109_p0 }
   0x9   :  { %117 = shalt.err (!%p114_p2)
}
   0xa   :  { %s118_s20 = scalar_lea.vmem %s17_s10, 128  ;;  %p123_p4 = scmp.lt.s32.totalorder %s17_s10, %s17_s10 }
   0xb   :  { %p119_p3 = scmp.ne.s32.totalorder %s17_s10, %s118_s20  ;;  %p124_p5 = scmp.lt.s32.totalorder %s118_s20, %s118_s20 }
   0xd   :  { %p125_p6 = por %p124_p5, %p123_p4 }
   0xf   :  { %p126_p7 = pnand %p125_p6, %p119_p3 }
  0x11   :  { %129 = shalt.err (!%p126_p7)
}
  0x12   :  { %19 = dma.hbm_to_vmem [thread:$0]  %s237_s0, 128, %s17_s10, [#allocation4]  }
  0x13   :  { %s130_s25 = scalar_lea.hbm %s238_s1, 128 }
  0x14   :  { %p131_p8 = scmp.ne.s32.totalorder %s238_s1, %s130_s25  ;;  %p134_p9 = scmp.lt.u32.totalorder %s130_s25, %s238_s1 }
  0x16   :  { %p136_p10 = pnand %p134_p9, %p131_p8 }
  0x18   :  { %139 = shalt.err (!%p136_p10)
}
  0x19   :  { %s140_s30 = scalar_lea.vmem %s32_s12, 128  ;;  %p145_p12 = scmp.lt.s32.totalorder %s32_s12, %s32_s12 }
  0x1a   :  { %p141_p11 = scmp.ne.s32.totalorder %s32_s12, %s140_s30  ;;  %p146_p13 = scmp.lt.s32.totalorder %s140_s30, %s140_s30 }
  0x1c   :  { %p147_p0 = por %p146_p13, %p145_p12 }
  0x1e   :  { %p148_p1 = pnand %p147_p0, %p141_p11 }
  0x20   :  { %151 = shalt.err (!%p148_p1)
}
  0x21   :  { %34 = dma.hbm_to_vmem [thread:$0]  %s238_s1, 128, %s32_s12, [#allocation7]  }
  0x22   :  { %174 = dma.done.wait [#allocation4], 128  }
  0x23   :  { %175 = vsyncadd [#allocation4], 4294967168 }
  0x24   :  { %176 = dma.done.wait [#allocation7], 128  }
  0x25   :  { %177 = vsyncadd [#allocation7], 4294967168  ;;  %v44_v0 = vld [vmem:[#allocation3] sm:$0xff]  ;;  %s182_s4 = smov 127   ;;  %v46_v1 = vld [vmem:[#allocation6] sm:$0xff]  ;;  %s183_s5 = smov 124  }
  0x26   :  { %53 = vrot.lane.b32.xlu0 %v44_v0, %s182_s4  ;;  %vm57_vm0 = vcmask 1039360   ;;  %s184_s6 = smov 126   ;;  %vm70_vm1 = vcmask 1031168   ;;  %vm78_vm2 = vcmask 1014784   ;;  %s185_s1 = smov [#allocation8]  }
  0x27   :  { %s90_s7 = sshll.u32 %s185_s1, 4  ;;  %s91_s7 = int_to_ptr.vmem [resolvable:$true] %s90_s7 }
  0x28   :  { %s152_s8 = scalar_lea.vmem %s91_s7, 128  ;;  %p157_p3 = scmp.lt.s32.totalorder %s91_s7, %s91_s7 }
  0x29   :  { %p153_p2 = scmp.ne.s32.totalorder %s91_s7, %s152_s8  ;;  %p158_p4 = scmp.lt.s32.totalorder %s152_s8, %s152_s8 }
  0x2a   :  { %55 = vrot.lane.b32.xlu0 %v46_v1, %s182_s4 }
  0x2b   :  { %p159_p5 = por %p158_p4, %p157_p3 }
  0x2d   :  { %p160_p6 = pnand %p159_p5, %p153_p2 }
  0x2e   :  { %74 = vrot.lane.b32.xlu0 %v44_v0, %s183_s5 }
  0x98   :  { %v54_v2 = vpop.permute.xlu0 %53 }
  0x9c   :  { %v56_v3 = vpop.permute.xlu0 %55 }
  0x9d   :  { %v63_v4 = vadd.f32 %v56_v3, %v46_v1  ;;  %v58_v5 = vsel %vm57_vm0, %v54_v2, %v56_v3 }
  0x9e   :  { %v60_v6 = vadd.f32 %v58_v5, %v44_v0 }
  0x9f   :  { %68 = vrot.lane.b32.xlu1 %v63_v4, %s184_s6 }
  0xa0   :  { %v75_v10 = vpop.permute.xlu0 %74 }
  0xa3   :  { %66 = vrot.lane.b32.xlu1 %v60_v6, %s184_s6 }
  0xa7   :  { %76 = vrot.lane.b32.xlu1 %v46_v1, %s183_s5 }
 0x111   :  { %v69_v7 = vpop.permute.xlu1 %68 }
 0x115   :  { %v67_v8 = vpop.permute.xlu1 %66 }
 0x116   :  { %v71_v9 = vsel %vm70_vm1, %v67_v8, %v69_v7 }
 0x117   :  { %v73_v11 = vadd.f32 %v71_v9, %v60_v6 }
 0x119   :  { %v77_v12 = vpop.permute.xlu1 %76 }
 0x11a   :  { %v79_v13 = vsel %vm78_vm2, %v75_v10, %v77_v12 }
 0x11b   :  { %v81_v14 = vadd.f32 %v79_v13, %v73_v11 }
 0x11d   :  { %v82_v15 = vmul.f32 0.2, %v81_v14 }
 0x11f   :  { %83 = vst [vmem:[#allocation8] sm:$0xff] %v82_v15 }
 0x120   :  { %163 = shalt.err (!%p160_p6)
}
 0x121   :  { %s164_s11 = scalar_lea.hbm %s239_s2, 128 }
 0x122   :  { %p165_p7 = scmp.ne.s32.totalorder %s239_s2, %s164_s11  ;;  %p168_p8 = scmp.lt.u32.totalorder %s164_s11, %s239_s2 }
 0x124   :  { %p170_p9 = pnand %p168_p8, %p165_p7 }
 0x126   :  { %173 = shalt.err (!%p170_p9)
}
 0x127   :  { %93 = dma.vmem_to_hbm [thread:$0]  %s91_s7, 128, %s239_s2, [#allocation5]  }
 0x128   :  { %178 = dma.done.wait [#allocation5], 128  }
 0x129   :  { %179 = vsyncadd [#allocation5], 4294967168 }
 0x12a   :  { %97 = vsyncpa [#allocation4], 1 }
 0x12b   :  { %98 = vsyncpa [#allocation7], 1 }
 0x12c   :  { %99 = vsyncpa [#allocation5], 1 }

</bundles_post_ra>
